<compile_context>
chip_gen: v7x
topology: tpu7x:2x2x1
jax: 0.10.0
libtpu: 0.0.40
codegen_flags: <defaults>
</compile_context>

<pallas_src>
import functools

import jax
import jax.numpy as jnp
from jax.experimental import pallas as pl
from jax.experimental.pallas import tpu as pltpu


def _round_up(x, m):
    return ((x + m - 1) // m) * m


def _detect_v7x():
    try:
        kind = jax.devices()[0].device_kind.lower()
        return ("v7" in kind) or ("tpu7" in kind)
    except Exception:
        return False


_IS_V7X = _detect_v7x()


# ----------------------------------------------------------------------------
# Kernel
# ----------------------------------------------------------------------------
def _spiking_dense_kernel(x_ref, w_ref, b_ref, o_ref, *,
                          t_min, t_max, output_layer, single_k):
    """Fused (tj - t_min) @ W + spiking transform.

    The t_min shift is applied to the x tile on the VPU (hidden under the MXU
    push); the accumulator lives in the resident f32 output block.
    Finalize:
      hidden: ti = acc + (t_max - D_i);  out = where(ti < t_max, ti, t_max)
      output: out = D_i - acc
    """
    x = x_ref[...]
    if t_min != 0.0:                       # trace-time specialization
        x = x - jnp.asarray(t_min, dtype=x.dtype)
    partial = jnp.dot(x, w_ref[...], preferred_element_type=jnp.float32)

    def finalize(acc):
        bias = b_ref[...]                  # (1, tn) f32, broadcasts over rows
        if output_layer:
            return bias - acc              # D_i - (tj - t_min) @ W
        ti = acc + bias                    # (tj - t_min) @ W + t_max - D_i
        t_max_f = jnp.float32(t_max)
        return jnp.where(ti < t_max_f, ti, t_max_f)

    if single_k:
        # Common inference case: one K step -> no init, no accumulate RMW.
        o_ref[...] = finalize(partial)
    else:
        k = pl.program_id(2)

        @pl.when(k == 0)
        def _():
            o_ref[...] = partial           # write, don't zero-init + add

        @pl.when(k > 0)
        def _():
            o_ref[...] = o_ref[...] + partial

        @pl.when(k == pl.num_programs(2) - 1)
        def _():
            o_ref[...] = finalize(o_ref[...])


# ----------------------------------------------------------------------------
# Static per-layer preparation (W is fixed: pad once, cache)
# ----------------------------------------------------------------------------
def prepare_spiking_dense(W, D_i, *, t_min, t_max, output_layer,
                          compute_dtype=None, max_tk=1024, max_tn=512):
    K, N = W.shape
    if compute_dtype is None:
        # keep bf16 weights bf16 (halves W HBM traffic, doubles MXU rate)
        compute_dtype = jnp.bfloat16 if W.dtype == jnp.bfloat16 else jnp.float32

    tk = min(_round_up(K, 128), max_tk)
    tn = min(_round_up(N, 128), max_tn)
    Kp, Np = _round_up(K, tk), _round_up(N, tn)

    Wp = W.astype(compute_dtype)
    if (Kp, Np) != (K, N):            # zero K/N padding is exact for the matmul
        Wp = jnp.pad(Wp, ((0, Kp - K), (0, Np - N)))

    d = jnp.reshape(D_i, (1, N)).astype(jnp.float32)
    bias = d if output_layer else (jnp.float32(t_max) - d)
    if Np != N:
        bias = jnp.pad(bias, ((0, 0), (0, Np - N)))

    return {
        "W": Wp, "bias": bias, "K": K, "N": N, "Kp": Kp, "Np": Np,
        "tk": tk, "tn": tn, "compute_dtype": compute_dtype,
        "t_min": float(t_min), "t_max": float(t_max),
        "output_layer": bool(output_layer),
    }


# ----------------------------------------------------------------------------
# Per-call application
# ----------------------------------------------------------------------------
def spiking_dense_apply(tj, prep, *, max_tm=512):
    M, K = tj.shape
    assert K == prep["K"], (K, prep["K"])
    cd = prep["compute_dtype"]
    N = prep["N"]
    tk, tn = prep["tk"], prep["tn"]
    Kp, Np = prep["Kp"], prep["Np"]

    sublane = 16 if cd == jnp.bfloat16 else 8
    tm = min(_round_up(M, sublane), max_tm)
    Mp = _round_up(M, tm)

    # v7x-only: if the parallel grid collapses to a single block, split N
    # across the two TensorCores -- only when this adds NO padding.
    if (_IS_V7X and Mp // tm == 1 and Np // tn == 1
            and Np >= 512 and Np % 256 == 0):
        tn = Np // 2

    x = tj.astype(cd)
    if (Mp, Kp) != (M, K):
        x = jnp.pad(x, ((0, Mp - M), (0, Kp - K)))

    Wp, bias = prep["W"], prep["bias"]
    grid = (Mp // tm, Np // tn, Kp // tk)
    single_k = (grid[2] == 1)

    in_item = jnp.dtype(cd).itemsize
    # actual HBM traffic including refetch: x once per N-block, W once per M-block
    cost = pl.CostEstimate(
        flops=2 * Mp * Np * Kp,
        transcendentals=0,
        bytes_accessed=(grid[1] * Mp * Kp * in_item
                        + grid[0] * Kp * Np * in_item
                        + Mp * Np * 4))

    footprint = (2 * (tm * tk + tk * tn) * in_item   # double-buffered inputs
                 + 2 * tm * tn * 4                   # resident/pipelined output
                 + 2 * tn * 4)                       # bias
    vmem_limit = int(min(max(footprint + (4 << 20), 16 << 20), 48 << 20))

    kernel = functools.partial(
        _spiking_dense_kernel,
        t_min=prep["t_min"], t_max=prep["t_max"],
        output_layer=prep["output_layer"], single_k=single_k)

    out = pl.pallas_call(
        kernel,
        out_shape=jax.ShapeDtypeStruct((Mp, Np), jnp.float32),
        grid_spec=pltpu.PrefetchScalarGridSpec(
            num_scalar_prefetch=0,
            grid=grid,
            in_specs=[
                pl.BlockSpec((tm, tk), lambda i, j, k: (i, k)),   # tj
                pl.BlockSpec((tk, tn), lambda i, j, k: (k, j)),   # W
                pl.BlockSpec((1, tn), lambda i, j, k: (0, j)),    # correction
            ],
            out_specs=pl.BlockSpec((tm, tn), lambda i, j, k: (i, j)),
        ),
        compiler_params=pltpu.CompilerParams(
            dimension_semantics=("parallel", "parallel", "arbitrary"),
            vmem_limit_bytes=vmem_limit),
        cost_estimate=cost,
    )(x, Wp, bias)

    if (Mp, Np) != (M, N):
        out = out[:M, :N]
    return out


def spiking_dense_forward(tj, W, D_i, *, t_min, t_max, t_min_prev=0.0,
                          output_layer=False, max_tm=512, max_tk=1024,
                          max_tn=512):
    """One-shot functional entry point (pads W on the fly)."""
    del t_min_prev  # alpha * (t_min - t_min_prev) == D_i, so it cancels.
    prep = prepare_spiking_dense(W, D_i, t_min=t_min, t_max=t_max,
                                 output_layer=output_layer,
                                 max_tk=max_tk, max_tn=max_tn)
    return spiking_dense_apply(tj, prep, max_tm=max_tm)


# ----------------------------------------------------------------------------
# JAX mirror of the PyTorch module (forward only)
# ----------------------------------------------------------------------------
class SpikingDense:
    def __init__(self, units, name, X_n=1, outputLayer=False,
                 robustness_params=None, input_dim=None):
        robustness_params = robustness_params or {}
        self.units = units
        self.name = name
        self.B_n = (1 + 0.0) * X_n
        self.outputLayer = outputLayer
        self.t_min_prev, self.t_min, self.t_max = 0.0, 0.0, 1.0
        self.noise = robustness_params.get('noise', 0.0)
        self.input_dim = input_dim
        self.bias = False
        self._prep = None
        self._prep_key = None
        # TODO(synk): noise > 0 adds torch.randn_like noise; deterministic demo uses noise=0.

    def build(self, input_dim, key):
        self.input_dim = input_dim
        # deterministic synthetic init (module's nn.Parameter(torch.empty(...)) is uninit)
        self.kernel = (jax.random.normal(key, (input_dim, self.units), jnp.float32)
                       * (1.0 / jnp.sqrt(input_dim)))
        self.D_i = jnp.zeros((self.units,), jnp.float32)
        self._prep = None

    def _prepare(self):
        key = (float(self.t_min), float(self.t_max), bool(self.outputLayer),
               id(self.kernel), id(self.D_i))
        if self._prep is None or self._prep_key != key:
            self._prep = prepare_spiking_dense(
                self.kernel, self.D_i, t_min=self.t_min, t_max=self.t_max,
                output_layer=self.outputLayer)
            self._prep_key = key
        return self._prep

    def forward(self, tj):
        return spiking_dense_apply(tj, self._prepare())


# ----------------------------------------------------------------------------
# Pure-JAX reference of the PyTorch forward (noise=0)
# ----------------------------------------------------------------------------
def _reference_forward(tj, W, D_i, t_min, t_max, t_min_prev, output_layer):
    threshold = t_max - t_min - D_i
    ti = jnp.matmul(tj - t_min, W, precision=jax.lax.Precision.HIGHEST) \
        + threshold + t_min
    out = jnp.where(ti < t_max, ti, t_max)
    if output_layer:
        W_mult_x = jnp.matmul(t_min - tj, W, precision=jax.lax.Precision.HIGHEST)
        alpha = D_i / (t_min - t_min_prev)
        out = alpha * (t_min - t_min_prev) + W_mult_x
    return out


if __name__ == "__main__":
    key = jax.random.PRNGKey(0)
    k_in, k_w1, k_w2, k_w3, k_in2, k_w4, k_in3, k_d = jax.random.split(key, 8)

    batch, input_dim, units = 8, 256, 128
    tj = jax.random.uniform(k_in, (batch, input_dim), jnp.float32, 0.0, 1.0)

    robustness = {'noise': 0.0, 'time_bits': 0, 'weight_bits': 0}

    # ---- hidden spiking layer -------------------------------------------
    hidden = SpikingDense(units, "dense_hidden", robustness_params=robustness)
    hidden.build(input_dim, k_w1)
    hidden.t_min_prev, hidden.t_min, hidden.t_max = 0.0, 1.0, 2.0

    out_hidden = hidden.forward(tj)
    jax.block_until_ready(out_hidden)
    ref_hidden = _reference_forward(tj, hidden.kernel, hidden.D_i,
                                    hidden.t_min, hidden.t_max,
                                    hidden.t_min_prev, False)
    assert out_hidden.shape == (batch, units)
    assert jnp.allclose(out_hidden, ref_hidden, atol=1e-3, rtol=1e-3)

    # ---- output (readout) layer on the hidden spike times ---------------
    readout = SpikingDense(units, "dense_out", outputLayer=True,
                           robustness_params=robustness)
    readout.build(units, k_w2)
    readout.t_min_prev, readout.t_min, readout.t_max = 1.0, 2.0, 3.0

    out_final = readout.forward(out_hidden)
    jax.block_until_ready(out_final)
    ref_final = _reference_forward(out_hidden, readout.kernel, readout.D_i,
                                   readout.t_min, readout.t_max,
                                   readout.t_min_prev, True)
    assert out_final.shape == (batch, units)
    assert jnp.allclose(out_final, ref_final, atol=1e-3, rtol=1e-3)

    # ---- non-divisible shapes exercise the padding path ------------------
    odd = SpikingDense(96, "dense_odd", robustness_params=robustness)
    odd.build(200, k_w3)
    odd.t_min_prev, odd.t_min, odd.t_max = 0.0, 1.0, 2.5
    tj_odd = jax.random.uniform(k_in2, (5, 200), jnp.float32, 0.0, 1.0)
    out_odd = odd.forward(tj_odd)
    jax.block_until_ready(out_odd)
    ref_odd = _reference_forward(tj_odd, odd.kernel, odd.D_i,
                                 odd.t_min, odd.t_max, odd.t_min_prev, False)
    assert out_odd.shape == (5, 96)
    assert jnp.allclose(out_odd, ref_odd, atol=1e-3, rtol=1e-3)

    # ---- multi-K-step accumulation path + nonzero D_i --------------------
    K_big, N_big, M_big = 384, 128, 8
    W_big = (jax.random.normal(k_w4, (K_big, N_big), jnp.float32)
             * (1.0 / jnp.sqrt(K_big)))
    D_big = 0.1 * jax.random.normal(k_d, (N_big,), jnp.float32)
    tj_big = jax.random.uniform(k_in3, (M_big, K_big), jnp.float32, 0.0, 1.0)

    out_mk = spiking_dense_forward(tj_big, W_big, D_big, t_min=0.5, t_max=1.75,
                                   output_layer=False, max_tk=128)
    jax.block_until_ready(out_mk)
    ref_mk = _reference_forward(tj_big, W_big, D_big, 0.5, 1.75, 0.0, False)
    assert jnp.allclose(out_mk, ref_mk, atol=1e-3, rtol=1e-3)

    out_mk_o = spiking_dense_forward(tj_big, W_big, D_big, t_min=0.5,
                                     t_max=1.75, t_min_prev=0.0,
                                     output_layer=True, max_tk=128)
    jax.block_until_ready(out_mk_o)
    ref_mk_o = _reference_forward(tj_big, W_big, D_big, 0.5, 1.75, 0.0, True)
    assert jnp.allclose(out_mk_o, ref_mk_o, atol=1e-3, rtol=1e-3)

    print("KERNEL_OK")
</pallas_src>

<mosaic_0001>
module attributes {stable_mosaic.version = 11 : i64} {
  func.func @_spiking_dense_kernel(%arg0: i32, %arg1: i32, %arg2: i32, %arg3: memref<8x256xf32, #tpu.memory_space<vmem>>, %arg4: memref<256x128xf32, #tpu.memory_space<vmem>>, %arg5: memref<1x128xf32, #tpu.memory_space<vmem>>, %arg6: memref<8x128xf32, #tpu.memory_space<vmem>>) attributes {dimension_semantics = [#tpu.dimension_semantics<parallel>, #tpu.dimension_semantics<parallel>, #tpu.dimension_semantics<arbitrary>], iteration_bounds = array<i64: 1, 1, 1>, scalar_prefetch = 0 : i64, scratch_operands = 0 : i64, tpu.core_type = #tpu.core_type<tc>, window_params = [{transform_indices = @transform_0, window_bounds = array<i64: 8, 256>}, {transform_indices = @transform_1, window_bounds = array<i64: 256, 128>}, {transform_indices = @transform_2, window_bounds = array<i64: 1, 128>}, {transform_indices = @transform_3, window_bounds = array<i64: 8, 128>}]} {
    %c0 = arith.constant 0 : index
    %c0_0 = arith.constant 0 : index
    %0 = vector.load %arg3[%c0, %c0_0] : memref<8x256xf32, #tpu.memory_space<vmem>>, vector<8x256xf32>
    %cst = arith.constant 1.000000e+00 : f32
    %1 = vector.broadcast %cst : f32 to vector<8x256xf32>
    %2 = arith.subf %0, %1 : vector<8x256xf32>
    %c0_1 = arith.constant 0 : index
    %c0_2 = arith.constant 0 : index
    %3 = vector.load %arg4[%c0_1, %c0_2] : memref<256x128xf32, #tpu.memory_space<vmem>>, vector<256x128xf32>
    %cst_3 = arith.constant dense<0.000000e+00> : vector<8x128xf32>
    %4 = tpu.matmul %2, %3, %cst_3 {dimension_numbers = #tpu.dot_dimension_numbers<[1], [0], [0], [1], [0, 0, 1, 1], [], []>} : vector<8x256xf32>, vector<256x128xf32>, vector<8x128xf32> -> vector<8x128xf32>
    %c0_4 = arith.constant 0 : index
    %c0_5 = arith.constant 0 : index
    %5 = vector.load %arg5[%c0_4, %c0_5] : memref<1x128xf32, #tpu.memory_space<vmem>>, vector<1x128xf32>
    %6 = vector.broadcast %5 : vector<1x128xf32> to vector<8x128xf32>
    %7 = arith.addf %4, %6 : vector<8x128xf32>
    %cst_6 = arith.constant 2.000000e+00 : f32
    %8 = vector.broadcast %cst_6 : f32 to vector<8x128xf32>
    %9 = arith.cmpf olt, %7, %8 : vector<8x128xf32>
    %cst_7 = arith.constant 2.000000e+00 : f32
    %10 = vector.broadcast %cst_7 : f32 to vector<8x128xf32>
    %11 = arith.select %9, %7, %10 : vector<8x128xi1>, vector<8x128xf32>
    %c0_8 = arith.constant 0 : index
    %c0_9 = arith.constant 0 : index
    %12 = vector.load %arg6[%c0_8, %c0_9] : memref<8x128xf32, #tpu.memory_space<vmem>>, vector<8x128xf32>
    tpu.vector_store %arg6[%c0_8, %c0_9], %11 {strides = array<i32>} : memref<8x128xf32, #tpu.memory_space<vmem>>, vector<8x128xf32>,
    return
  }
  func.func @transform_0(%arg0: i32, %arg1: i32, %arg2: i32) -> (i32, i32) {
    %c0_i32 = arith.constant 0 : i32
    return %arg0, %arg2 : i32, i32
  }
  func.func @transform_1(%arg0: i32, %arg1: i32, %arg2: i32) -> (i32, i32) {
    %c0_i32 = arith.constant 0 : i32
    return %arg2, %arg1 : i32, i32
  }
  func.func @transform_2(%arg0: i32, %arg1: i32, %arg2: i32) -> (i32, i32) {
    %c0_i32 = arith.constant 0 : i32
    %c0_i32_0 = arith.constant 0 : i32
    return %c0_i32, %arg1 : i32, i32
  }
  func.func @transform_3(%arg0: i32, %arg1: i32, %arg2: i32) -> (i32, i32) {
    %c0_i32 = arith.constant 0 : i32
    return %arg0, %arg1 : i32, i32
  }
}

</mosaic_0001>

<bundles_post_ra>
// kernel: tpu_custom_call.1
= control target key start
LH: loop header
LB: loop body
LE: loop exit
PB: predicated region body
PF: predicated region fallthrough
CT: control target
= control target key end

     0   :  { %8 = vsyncpa [#allocation3], 0  ;;  %s391_s0 = inlined_call_operand.hbm [shape: f32[8,256], index: 0, kind: input, shape index: {}]   ;;  %s392_s1 = inlined_call_operand.hbm [shape: f32[256,128], index: 1, kind: input, shape index: {}]   ;;  %s393_s2 = inlined_call_operand.vmem [shape: f32[1,128], index: 2, kind: input, shape index: {}]   ;;  %s394_s3 = inlined_call_operand.hbm [shape: f32[8,128], index: 3, kind: output, shape index: {}]  }
   0x1   :  { %9 = vsyncpa [#allocation6], 0 }
   0x2   :  { %10 = vsyncpa [#allocation4], 0  ;;  %s320_s12 = smov [#allocation2]   ;;  %s321_s14 = smov [#allocation5]  }
   0x3   :  { %s17_s13 = sshll.u32 %s320_s12, 4  ;;  %s26_s15 = sshll.u32 %s321_s14, 4  ;;  %s18_s13 = int_to_ptr.vmem [resolvable:$true] %s17_s13  ;;  %s345_s15 = int_to_ptr.vmem [resolvable:$true] %s26_s15 }
   0x4   :  { %s248_s18 = scalar_lea.hbm %s391_s0, 256 }
   0x5   :  { %p249_p0 = scmp.ne.s32.totalorder %s391_s0, %s248_s18  ;;  %p252_p1 = scmp.lt.u32.totalorder %s248_s18, %s391_s0 }
   0x7   :  { %p254_p2 = pnand %p252_p1, %p249_p0 }
   0x9   :  { %257 = shalt.err (!%p254_p2)
}
   0xa   :  { %s258_s23 = scalar_lea.vmem %s18_s13, 256  ;;  %p263_p4 = scmp.lt.s32.totalorder %s18_s13, %s18_s13 }
   0xb   :  { %p259_p3 = scmp.ne.s32.totalorder %s18_s13, %s258_s23  ;;  %p264_p5 = scmp.lt.s32.totalorder %s258_s23, %s258_s23 }
   0xd   :  { %p265_p6 = por %p264_p5, %p263_p4 }
   0xf   :  { %p266_p7 = pnand %p265_p6, %p259_p3 }
  0x11   :  { %269 = shalt.err (!%p266_p7)
}
  0x12   :  { %20 = dma.hbm_to_vmem [thread:$0]  %s391_s0, 256, %s18_s13, [#allocation3]  }
  0x13   :  { %s270_s28 = scalar_lea.hbm %s392_s1, 4096 }
  0x14   :  { %p271_p8 = scmp.ne.s32.totalorder %s392_s1, %s270_s28  ;;  %p274_p9 = scmp.lt.u32.totalorder %s270_s28, %s392_s1 }
  0x16   :  { %p276_p10 = pnand %p274_p9, %p271_p8 }
  0x18   :  { %279 = shalt.err (!%p276_p10)
}
  0x19   :  { %s280_s6 = scalar_lea.vmem %s345_s15, 4096  ;;  %p285_p12 = scmp.lt.s32.totalorder %s345_s15, %s345_s15 }
  0x1a   :  { %p281_p11 = scmp.ne.s32.totalorder %s345_s15, %s280_s6  ;;  %p286_p13 = scmp.lt.s32.totalorder %s280_s6, %s280_s6 }
  0x1c   :  { %p287_p0 = por %p286_p13, %p285_p12 }
  0x1e   :  { %p288_p1 = pnand %p287_p0, %p281_p11 }
  0x20   :  { %291 = shalt.err (!%p288_p1)
}
  0x21   :  { %s322_s0 = smov 128   ;;  %s323_s7 = smov 8  }
  0x22   :  { %32 = dma.hbm_to_vmem [thread:$0]  %s392_s1, 4096, %s345_s15, [#allocation6], %s322_s0, %s322_s0, %s323_s7  }
  0x23   :  { %314 = dma.done.wait [#allocation3], 256  }
  0x24   :  { %315 = vsyncadd [#allocation3], 4294967040 }
  0x25   :  { %316 = dma.done.wait [#allocation6], 4096  }
  0x26   :  { %317 = vsyncadd [#allocation6], 4294963200  ;;  %v61_v0 = vld [vmem:[#allocation5 + $0x80] sm:$0xff]  ;;  %v62_v1 = vld [vmem:[#allocation5 + $0x88] sm:$0xff]  ;;  %s324_s11 = smov [#allocation7]  }
  0x27   :  { %v45_v2 = vld [vmem:[#allocation5] sm:$0xff]  ;;  %v211_v3 = vpack.c.bf16 %v62_v1, %v61_v0  ;;  %v46_v4 = vld [vmem:[#allocation5 + $0x8] sm:$0xff]  ;;  %v63_v5 = vld [vmem:[#allocation5 + $0x90] sm:$0xff]  ;;  %s163_s12 = sshll.u32 %s324_s11, 4  ;;  %s164_s12 = int_to_ptr.vmem [resolvable:$true] %s163_s12 }
  0x28   :  { %v64_v6 = vld [vmem:[#allocation5 + $0x98] sm:$0xff]  ;;  %v213_v7 = vpack.c.bf16 %v46_v4, %v45_v2  ;;  %v47_v9 = vld [vmem:[#allocation5 + $0x10] sm:$0xff]  ;;  %v65_v11 = vld [vmem:[#allocation5 + $0xa0] sm:$0xff]  ;;  %s292_s13 = scalar_lea.vmem %s164_s12, 128  ;;  %p297_p3 = scmp.lt.s32.totalorder %s164_s12, %s164_s12 }
  0x29   :  { %v215_v8 = vpack.c.bf16 %v64_v6, %v63_v5  ;;  %v48_v10 = vld [vmem:[#allocation5 + $0x18] sm:$0xff]  ;;  %212 = vmatprep.subr.bf16.mxu0 %v211_v3  ;;  %v66_v12 = vld [vmem:[#allocation5 + $0xa8] sm:$0xff]  ;;  %v49_v15 = vld [vmem:[#allocation5 + $0x20] sm:$0xff]  ;;  %p293_p2 = scmp.ne.s32.totalorder %s164_s12, %s292_s13  ;;  %p298_p4 = scmp.lt.s32.totalorder %s292_s13, %s292_s13 }
  0x2a   :  { %214 = vmatpush3.bf16.msra.mxu0 %v213_v7  ;;  %v217_v13 = vpack.c.bf16 %v48_v10, %v47_v9  ;;  %v219_v14 = vpack.c.bf16 %v66_v12, %v65_v11  ;;  %v50_v16 = vld [vmem:[#allocation5 + $0x28] sm:$0xff]  ;;  %v67_v17 = vld [vmem:[#allocation5 + $0xb0] sm:$0xff]  ;;  %v68_v18 = vld [vmem:[#allocation5 + $0xb8] sm:$0xff] }
  0x2b   :  { %216 = vmatprep.subr.bf16.mxu0 %v215_v8  ;;  %v221_v19 = vpack.c.bf16 %v50_v16, %v49_v15  ;;  %v223_v20 = vpack.c.bf16 %v68_v18, %v67_v17  ;;  %v51_v21 = vld [vmem:[#allocation5 + $0x30] sm:$0xff]  ;;  %v52_v22 = vld [vmem:[#allocation5 + $0x38] sm:$0xff]  ;;  %v69_v23 = vld [vmem:[#allocation5 + $0xc0] sm:$0xff]  ;;  %p299_p5 = por %p298_p4, %p297_p3 }
  0x2c   :  { %v70_v24 = vld [vmem:[#allocation5 + $0xc8] sm:$0xff]  ;;  %v42_v25 = vld [vmem:[#allocation2 + $0x8] sm:$0xff]  ;;  %v225_v27 = vpack.c.bf16 %v52_v22, %v51_v21  ;;  %v53_v29 = vld [vmem:[#allocation5 + $0x40] sm:$0xff] }
  0x2d   :  { %v174_v26 = vadd.f32 -1.0, %v42_v25  ;;  %v227_v28 = vpack.c.bf16 %v70_v24, %v69_v23  ;;  %v54_v30 = vld [vmem:[#allocation5 + $0x48] sm:$0xff]  ;;  %v71_v31 = vld [vmem:[#allocation5 + $0xd0] sm:$0xff]  ;;  %v72_v32 = vld [vmem:[#allocation5 + $0xd8] sm:$0xff]  ;;  %p300_p6 = pnand %p299_p5, %p293_p2 }
  0x2e   :  { %218 = vmatpush3.bf16.msra.mxu0 %v217_v13  ;;  %v229_v33 = vpack.c.bf16 %v54_v30, %v53_v29  ;;  %v231_v34 = vpack.c.bf16 %v72_v32, %v71_v31  ;;  %v55_v35 = vld [vmem:[#allocation5 + $0x50] sm:$0xff]  ;;  %v56_v36 = vld [vmem:[#allocation5 + $0x58] sm:$0xff]  ;;  %v73_v37 = vld [vmem:[#allocation5 + $0xe0] sm:$0xff] }
  0x2f   :  { %220 = vmatprep.subr.bf16.mxu0 %v219_v14  ;;  %148 = vmatprep.mubr.f32.mxu0 %v174_v26  ;;  %v74_v38 = vld [vmem:[#allocation5 + $0xe8] sm:$0xff]  ;;  %v233_v39 = vpack.c.bf16 %v56_v36, %v55_v35  ;;  %v57_v41 = vld [vmem:[#allocation5 + $0x60] sm:$0xff]  ;;  %v75_v43 = vld [vmem:[#allocation5 + $0xf0] sm:$0xff] }
  0x30   :  { %v235_v40 = vpack.c.bf16 %v74_v38, %v73_v37  ;;  %v58_v42 = vld [vmem:[#allocation5 + $0x68] sm:$0xff]  ;;  %v76_v44 = vld [vmem:[#allocation5 + $0xf8] sm:$0xff]  ;;  %v59_v47 = vld [vmem:[#allocation5 + $0x70] sm:$0xff] }
  0x31   :  { %v237_v45 = vpack.c.bf16 %v58_v42, %v57_v41  ;;  %v239_v46 = vpack.c.bf16 %v76_v44, %v75_v43  ;;  %v60_v48 = vld [vmem:[#allocation5 + $0x78] sm:$0xff]  ;;  %v41_v50 = vld [vmem:[#allocation2] sm:$0xff] }
  0x32   :  { %222 = vmatpush3.bf16.msra.mxu0 %v221_v19  ;;  %v241_v49 = vpack.c.bf16 %v60_v48, %v59_v47  ;;  %v173_v51 = vadd.f32 -1.0, %v41_v50  ;;  %v175_v53 = vld [vmem:[%s393_s2] ss:$0 sm:$0xff] }
  0x33   :  { %224 = vmatprep.subr.bf16.mxu0 %v223_v20 }
  0x36   :  { %226 = vmatpush3.bf16.msra.mxu0 %v225_v27 }
  0x37   :  { %228 = vmatprep.subr.bf16.mxu0 %v227_v28 }
  0x3a   :  { %230 = vmatpush3.bf16.msra.mxu0 %v229_v33 }
  0x3b   :  { %232 = vmatprep.subr.bf16.mxu0 %v231_v34 }
  0x3e   :  { %234 = vmatpush3.bf16.msra.mxu0 %v233_v39 }
  0x3f   :  { %236 = vmatprep.subr.bf16.mxu0 %v235_v40 }
  0x42   :  { %238 = vmatpush3.bf16.msra.mxu0 %v237_v45 }
  0x43   :  { %240 = vmatprep.subr.bf16.mxu0 %v239_v46 }
  0x46   :  { %242 = vmatpush3.bf16.msra.mxu0 %v241_v49 }
  0x49   :  { %149 = vmatmul.mubr.f32.vlgmr.msra.gmra.mrb[0].mxu0 %v173_v51 }
 0x11c   :  { %v208_v52 = vpop.f32.mrb[0].mxu0 }
 0x11d   :  { %v209_v54 = vpop.f32.mrb[1].mxu0 }
 0x11e   :  { %v210_v55 = vadd.f32 %v209_v54, %v208_v52 }
 0x120   :  { %v151_v56 = vadd.f32 %v210_v55, %v175_v53 }
 0x122   :  { %vm154_vm0 = vcmp.lt.f32.partialorder %v151_v56, 2.0 }
 0x123   :  { %v155_v57 = vsel %vm154_vm0, %v151_v56, 2.0 }
 0x124   :  { %156 = vst [vmem:[#allocation7] sm:$0xff] %v155_v57 }
 0x125   :  { %303 = shalt.err (!%p300_p6)
}
 0x126   :  { %s304_s2 = scalar_lea.hbm %s394_s3, 128 }
 0x127   :  { %p305_p7 = scmp.ne.s32.totalorder %s394_s3, %s304_s2  ;;  %p308_p8 = scmp.lt.u32.totalorder %s304_s2, %s394_s3 }
 0x129   :  { %p310_p9 = pnand %p308_p8, %p305_p7 }
 0x12b   :  { %313 = shalt.err (!%p310_p9)
}
 0x12c   :  { %166 = dma.vmem_to_hbm [thread:$0]  %s164_s12, 128, %s394_s3, [#allocation4]  }
 0x12d   :  { %318 = dma.done.wait [#allocation4], 128  }
 0x12e   :  { %319 = vsyncadd [#allocation4], 4294967168 }
 0x12f   :  { %170 = vsyncpa [#allocation3], 1 }
 0x130   :  { %171 = vsyncpa [#allocation6], 1 }
 0x131   :  { %172 = vsyncpa [#allocation4], 1 }

</bundles_post_ra>
